<compile_context>
chip_gen: v6e
topology: v6e:2x2x1
jax: 0.10.0
libtpu: 0.0.40
codegen_flags: <defaults>
</compile_context>

<pallas_src>
import functools
import math

import jax
import jax.numpy as jnp
from jax.experimental import pallas as pl
from jax.experimental.pallas import tpu as pltpu


def _rmsnorm_kernel(x_ref, w_ref, o_ref, *, eps: float, inv_dim: float):
    # x_ref: (tile_rows, dim), w_ref: (1, dim), o_ref: (tile_rows, dim).
    x = x_ref[...]
    xf = x.astype(jnp.float32)                       # x.float()
    ss = jnp.sum(xf * xf, axis=-1, keepdims=True)    # XLU reduce (free slot)
    inv = jax.lax.rsqrt(ss * inv_dim + eps)          # EUP rsqrt (free slot)
    normed = (xf * inv).astype(x.dtype)              # .type_as(x)
    o_ref[...] = (normed * w_ref[...]).astype(o_ref.dtype)   # * weight


def _sublane_multiple(dtype) -> int:
    # 4B -> 8 sublanes, 2B -> 16, 1B -> 32 (one packed vreg of rows).
    return max(8, 32 // jnp.dtype(dtype).itemsize)


def _round_up(v: int, m: int) -> int:
    return ((v + m - 1) // m) * m


def _tpu_vmem_and_num_tc():
    """Best-effort hardware query; falls back to v7x-safe defaults."""
    vmem_bytes = 64 << 20   # v7x per-TC physical VMEM (smallest generation)
    num_tc = 1
    try:
        info = pltpu.get_tpu_info()
        for attr in ("vmem_capacity_bytes", "vmem_bytes"):
            if hasattr(info, attr):
                vmem_bytes = int(getattr(info, attr))
                break
    except Exception:
        pass
    try:
        kind = jax.devices()[0].device_kind.lower()
        if "v7" in kind or "7x" in kind:
            num_tc = 2
    except Exception:
        pass
    return vmem_bytes, num_tc


def _pick_tile_rows(rows: int, dim: int, x_itemsize: int, out_itemsize: int,
                    sublane: int, vmem_bytes: int, num_tc: int) -> int:
    """Tile rows for a mem-bound kernel.

    Working-set estimate per row: 2x double-buffered input, 2x double-buffered
    output, ~2 f32-sized intermediates. Target ~2 MiB per input block (HBM
    roofline plateau); cap by a ~40% VMEM budget so the same tile compiles on
    v7x (64 MiB/TC) as well as v5e/v6e (128 MiB).
    """
    budget = int(0.4 * vmem_bytes)
    per_row = dim * (2 * x_itemsize + 2 * out_itemsize + 2 * 4)
    t_budget = max(sublane, budget // max(per_row, 1))

    target_block_bytes = 2 << 20
    t_bw = max(sublane, target_block_bytes // max(dim * x_itemsize, 1))

    t = min(t_budget, t_bw, max(_round_up(rows, sublane), sublane))
    t = max(sublane, (t // sublane) * sublane)

    if num_tc >= 2 and rows > sublane:
        # v7x megacore: keep >=2 grid steps and prefer an even step count so
        # both TensorCores get equal work on this mem-bound kernel.
        steps = -(-rows // t)
        if steps == 1:
            t = max(sublane, (-(-rows // 2) // sublane) * sublane)
            if t * 2 < rows:  # rounding down made 3 steps; round up instead
                t = _round_up(-(-rows // 2), sublane)
            steps = -(-rows // t)
        if steps > 1 and steps % 2 == 1:
            t_even = _round_up(-(-rows // (steps + 1)), sublane)
            if t_even >= sublane and (-(-rows // t_even)) % 2 == 0:
                t = t_even
    return t


def rmsnorm(x: jax.Array, weight: jax.Array, eps: float,
            *, tile_rows: int | None = None,
            cast_weight_to_x_dtype: bool = False):
    """RMSNorm over the last axis of x, matching the PyTorch module semantics.

    cast_weight_to_x_dtype=True is an opt-in fast path (output stays x.dtype,
    halving HBM write bytes for bf16 activations); default keeps strict
    promote(x, weight) output dtype like the PyTorch module.
    """
    orig_shape = x.shape
    dim = orig_shape[-1]
    rows = 1
    for s in orig_shape[:-1]:
        rows *= s

    x2d = x.reshape(rows, dim)
    if cast_weight_to_x_dtype:
        weight = weight.astype(x.dtype)
    w2d = weight.reshape(1, dim)

    out_dtype = jnp.promote_types(x.dtype, weight.dtype)

    x_itemsize = jnp.dtype(x.dtype).itemsize
    out_itemsize = jnp.dtype(out_dtype).itemsize
    sublane = max(_sublane_multiple(x.dtype), _sublane_multiple(out_dtype))

    vmem_bytes, num_tc = _tpu_vmem_and_num_tc()

    if tile_rows is None:
        tile_rows = _pick_tile_rows(rows, dim, x_itemsize, out_itemsize,
                                    sublane, vmem_bytes, num_tc)
    tile_rows = max(sublane, (tile_rows // sublane) * sublane)

    grid = (pl.cdiv(rows, tile_rows),)

    cost = pl.CostEstimate(
        flops=4 * rows * dim,
        transcendentals=rows,
        bytes_accessed=rows * dim * (x_itemsize + out_itemsize)
        + dim * jnp.dtype(weight.dtype).itemsize,
    )

    out2d = pl.pallas_call(
        functools.partial(_rmsnorm_kernel, eps=eps, inv_dim=1.0 / dim),
        out_shape=jax.ShapeDtypeStruct((rows, dim), out_dtype),
        grid_spec=pltpu.PrefetchScalarGridSpec(
            num_scalar_prefetch=0,
            grid=grid,
            in_specs=[
                # Last block dim is the full array dim (no pad copy needed).
                pl.BlockSpec((tile_rows, dim), lambda i: (i, 0)),
                pl.BlockSpec((1, dim), lambda i: (0, 0)),
            ],
            out_specs=pl.BlockSpec((tile_rows, dim), lambda i: (i, 0)),
        ),
        compiler_params=pltpu.CompilerParams(
            dimension_semantics=("parallel",),
            vmem_limit_bytes=min(int(0.6 * vmem_bytes), 96 * 1024 * 1024),
        ),
        cost_estimate=cost,
    )(x2d, w2d)

    return out2d.reshape(orig_shape)


def rmsnorm_ref(x, weight, eps):
    xf = x.astype(jnp.float32)
    inv = jax.lax.rsqrt(jnp.mean(xf * xf, axis=-1, keepdims=True) + eps)
    normed = (xf * inv).astype(x.dtype)
    return normed * weight


if __name__ == "__main__":
    key = jax.random.PRNGKey(0)
    batch, seq, hidden = 2, 8, 32
    eps = 1e-6

    x = jax.random.normal(key, (batch, seq, hidden), dtype=jnp.float32)
    # Deterministic parameter init: nn.Parameter(torch.ones(dim))
    weight = jnp.ones((hidden,), dtype=jnp.float32)

    out = rmsnorm(x, weight, eps)
    out = jax.block_until_ready(out)

    ref = rmsnorm_ref(x, weight, eps)
    assert out.shape == x.shape
    assert out.dtype == ref.dtype
    assert jnp.allclose(out, ref, atol=1e-5, rtol=1e-5), "mismatch vs reference"

    print("KERNEL_OK")
</pallas_src>

<mosaic_0001>
module attributes {stable_mosaic.version = 11 : i64} {
  func.func @_rmsnorm_kernel(%arg0: i32, %arg1: memref<16x32xf32, #tpu.memory_space<vmem>>, %arg2: memref<1x32xf32, #tpu.memory_space<vmem>>, %arg3: memref<16x32xf32, #tpu.memory_space<vmem>>) attributes {dimension_semantics = [#tpu.dimension_semantics<parallel>], iteration_bounds = array<i64: 1>, scalar_prefetch = 0 : i64, scratch_operands = 0 : i64, tpu.core_type = #tpu.core_type<tc>, window_params = [{transform_indices = @transform_0, window_bounds = array<i64: 16, 32>}, {pipeline_mode = #tpu.pipeline_mode<synchronous>, transform_indices = @transform_1, window_bounds = array<i64: 1, 32>}, {transform_indices = @transform_2, window_bounds = array<i64: 16, 32>}]} {
    %c0 = arith.constant 0 : index
    %c0_0 = arith.constant 0 : index
    %0 = vector.load %arg1[%c0, %c0_0] : memref<16x32xf32, #tpu.memory_space<vmem>>, vector<16x32xf32>
    %1 = arith.mulf %0, %0 : vector<16x32xf32>
    %cst = arith.constant dense<0.000000e+00> : vector<16xf32>
    %2 = vector.multi_reduction <add>, %1, %cst [1] : vector<16x32xf32> to vector<16xf32>
    %3 = vector.shape_cast %2 : vector<16xf32> to vector<16x1xf32>
    %cst_1 = arith.constant 3.125000e-02 : f32
    %4 = vector.broadcast %cst_1 : f32 to vector<16x1xf32>
    %5 = arith.mulf %3, %4 : vector<16x1xf32>
    %cst_2 = arith.constant 9.99999997E-7 : f32
    %6 = vector.broadcast %cst_2 : f32 to vector<16x1xf32>
    %7 = arith.addf %5, %6 : vector<16x1xf32>
    %8 = math.rsqrt %7 : vector<16x1xf32>
    %9 = vector.broadcast %8 : vector<16x1xf32> to vector<16x32xf32>
    %10 = arith.mulf %0, %9 : vector<16x32xf32>
    %c0_3 = arith.constant 0 : index
    %c0_4 = arith.constant 0 : index
    %11 = vector.load %arg2[%c0_3, %c0_4] : memref<1x32xf32, #tpu.memory_space<vmem>>, vector<1x32xf32>
    %12 = vector.broadcast %11 : vector<1x32xf32> to vector<16x32xf32>
    %13 = arith.mulf %10, %12 : vector<16x32xf32>
    %c0_5 = arith.constant 0 : index
    %c0_6 = arith.constant 0 : index
    %14 = vector.load %arg3[%c0_5, %c0_6] : memref<16x32xf32, #tpu.memory_space<vmem>>, vector<16x32xf32>
    tpu.vector_store %arg3[%c0_5, %c0_6], %13 {strides = array<i32>} : memref<16x32xf32, #tpu.memory_space<vmem>>, vector<16x32xf32>,
    return
  }
  func.func @transform_0(%arg0: i32) -> (i32, i32) {
    %c0_i32 = arith.constant 0 : i32
    %c0_i32_0 = arith.constant 0 : i32
    return %arg0, %c0_i32 : i32, i32
  }
  func.func @transform_1(%arg0: i32) -> (i32, i32) {
    %c0_i32 = arith.constant 0 : i32
    %c0_i32_0 = arith.constant 0 : i32
    %c0_i32_1 = arith.constant 0 : i32
    return %c0_i32, %c0_i32_0 : i32, i32
  }
  func.func @transform_2(%arg0: i32) -> (i32, i32) {
    %c0_i32 = arith.constant 0 : i32
    %c0_i32_0 = arith.constant 0 : i32
    return %arg0, %c0_i32 : i32, i32
  }
}

</mosaic_0001>

<bundles_post_ra>
// kernel: tpu_custom_call.1
= control target key start
LH: loop header
LB: loop body
LE: loop exit
PB: predicated region body
PF: predicated region fallthrough
CT: control target
= control target key end

     0   :  { %7 = vsyncpa [#allocation3], 0  ;;  %s164_s0 = inlined_call_operand.hbm [shape: f32[16,32], index: 0, kind: input, shape index: {}]   ;;  %s165_s1 = inlined_call_operand.vmem [shape: f32[1,32], index: 1, kind: input, shape index: {}]   ;;  %s166_s2 = inlined_call_operand.hbm [shape: f32[16,32], index: 2, kind: output, shape index: {}]  }
   0x1   :  { %8 = vsyncpa [#allocation4], 0  ;;  %s126_s9 = smov [#allocation2]  }
   0x2   :  { %s14_s10 = sshll.u32 %s126_s9, 4  ;;  %s15_s10 = int_to_ptr.vmem [resolvable:$true] %s14_s10 }
   0x3   :  { %s90_s11 = scalar_lea.vmem %s15_s10, 256  ;;  %p95_p1 = scmp.lt.s32.totalorder %s15_s10, %s15_s10 }
   0x4   :  { %p91_p0 = scmp.ne.s32.totalorder %s15_s10, %s90_s11  ;;  %p96_p2 = scmp.lt.s32.totalorder %s90_s11, %s90_s11 }
   0x6   :  { %p97_p3 = por %p96_p2, %p95_p1 }
   0x8   :  { %p98_p4 = pnand %p97_p3, %p91_p0 }
   0xa   :  { %101 = shalt.err (!%p98_p4)
}
   0xb   :  { %s127_s12 = smov 128   ;;  %s128_s13 = smov 8  }
   0xc   :  { %20 = dma.hbm_to_vmem [thread:$0]  %s164_s0, 256, %s15_s10, [#allocation3], %s127_s12, %s127_s12, %s128_s13  }
   0xd   :  { %122 = dma.done.wait [#allocation3], 256  }
   0xe   :  { %123 = vsyncadd [#allocation3], 4294967040  ;;  %v26_v0 = vld [vmem:[#allocation2] sm:$0xff]  ;;  %vm30_vm0 = vcmask 261120   ;;  %v27_v1 = vld [vmem:[#allocation2 + $0x8] sm:$0xff]  ;;  %s129_s17 = smov [#allocation5]  }
   0xf   :  { %v28_v2 = vmul.f32 %v26_v0, %v26_v0  ;;  %v29_v3 = vmul.f32 %v27_v1, %v27_v1  ;;  %v73_v13 = vld [vmem:[%s165_s1] ss:$0 sm:$0xff]  ;;  %s61_s18 = sshll.u32 %s129_s17, 4  ;;  %s62_s18 = int_to_ptr.vmem [resolvable:$true] %s61_s18 }
  0x10   :  { %s102_s19 = scalar_lea.vmem %s62_s18, 256  ;;  %p107_p6 = scmp.lt.s32.totalorder %s62_s18, %s62_s18 }
  0x11   :  { %v31_v4 = vsel %vm30_vm0, %v28_v2, 0.0  ;;  %v34_v5 = vsel %vm30_vm0, %v29_v3, 0.0  ;;  %p103_p5 = scmp.ne.s32.totalorder %s62_s18, %s102_s19  ;;  %p108_p7 = scmp.lt.s32.totalorder %s102_s19, %s102_s19 }
  0x12   :  { %32 = vadd.xlane.f32.xlu0 %v31_v4 }
  0x13   :  { %p109_p8 = por %p108_p7, %p107_p6 }
  0x15   :  { %p110_p9 = pnand %p109_p8, %p103_p5 }
  0x16   :  { %35 = vadd.xlane.f32.xlu0 %v34_v5 }
  0x9b   :  { %v33_v6 = vpop.xlane.xlu0 %32 }
  0x9c   :  { %v37_v7 = vmul.f32 0.03125, %v33_v6 }
  0x9e   :  { %v39_v8 = vadd.f32 1e-06, %v37_v7 }
  0x9f   :  { %v36_v9 = vpop.xlane.xlu0 %35 }
  0xa0   :  { %78 = vrsqrt.f32 %v39_v8  ;;  %v38_v10 = vmul.f32 0.03125, %v36_v9 }
  0xa2   :  { %v40_v11 = vadd.f32 1e-06, %v38_v10 }
  0xa4   :  { %80 = vrsqrt.f32 %v40_v11 }
  0xad   :  { %v79_v12 = vpop.eup %78 }
  0xae   :  { %v43_v14 = vmul.f32 %v79_v12, %v26_v0 }
  0xb0   :  { %v52_v15 = vmul.f32 %v73_v13, %v43_v14 }
  0xb1   :  { %v81_v16 = vpop.eup %80 }
  0xb2   :  { %v44_v17 = vmul.f32 %v81_v16, %v27_v1  ;;  %54 = vst.msk [vmem:[#allocation5] sm:$0xff] %vm30_vm0, %v52_v15 }
  0xb4   :  { %v53_v18 = vmul.f32 %v73_v13, %v44_v17 }
  0xb6   :  { %55 = vst.msk [vmem:[#allocation5 + $0x8] sm:$0xff] %vm30_vm0, %v53_v18 }
  0xb7   :  { %113 = shalt.err (!%p110_p9)
}
  0xb8   :  { %67 = dma.vmem_to_hbm [thread:$0]  %s62_s18, 256, %s166_s2, [#allocation4], %s127_s12, %s127_s12, %s128_s13  }
  0xb9   :  { %124 = dma.done.wait [#allocation4], 256  }
  0xba   :  { %125 = vsyncadd [#allocation4], 4294967040 }
  0xbb   :  { %71 = vsyncpa [#allocation3], 1 }
  0xbc   :  { %72 = vsyncpa [#allocation4], 1 }

</bundles_post_ra>
